<compile_context>
chip_gen: v7x
topology: tpu7x:2x2x1
jax: 0.10.0
libtpu: 0.0.40
codegen_flags: <defaults>
</compile_context>

<pallas_src>
from functools import partial

import jax
import jax.numpy as jnp
from jax.experimental import pallas as pl
from jax.experimental.pallas import tpu as pltpu


def _round_up(x, m):
    return ((x + m - 1) // m) * m


def query_encoder_kernel(q_ref, s_ref, st_ref, w_ref, b_ref, out_ref, *,
                         input_dim, process_step):
    D = input_dim
    H = 2 * D

    q_f32 = q_ref[...]                         # (TB, D)  f32  residual path
    q_bf = q_f32.astype(jnp.bfloat16)          # cast once, outside the loop
    s = s_ref[...]                             # (FEW, D) bf16
    s_t = st_ref[...]                          # (D, FEW) bf16 (pre-transposed)
    w = w_ref[...]                             # (3D, 4H) bf16, gate cols (i,f,o,g)
    b = b_ref[...]                             # (1, 4H)  f32  (b_ih + b_hh, permuted)

    B = q_f32.shape[0]

    c = jnp.zeros((B, H), jnp.float32)         # LSTM cell state (f32)
    hr_bf = jnp.zeros((B, H), jnp.bfloat16)    # concat(h, r) recurrent input
    h = q_f32                                  # result (process_step > 0 guaranteed)

    # process_step is small & static -> fully unrolled Python loop.
    for _ in range(process_step):
        # Fused gate matmul: [q | h | r] @ [W_ih^T ; W_hh^T]  (K = 3D).
        x = jnp.concatenate([q_bf, hr_bf], axis=1)                       # (B, 3D)
        gates = jnp.dot(x, w, preferred_element_type=jnp.float32) + b    # (B, 4H)

        # Gate columns are pre-permuted to (i, f, o, g): one wide sigmoid on the
        # first 3H lanes, one tanh on the last H lanes.
        sig = jax.nn.sigmoid(gates[:, :3 * H])
        i_g = sig[:, 0 * H:1 * H]
        f_g = sig[:, 1 * H:2 * H]
        o_g = sig[:, 2 * H:3 * H]
        g_g = jnp.tanh(gates[:, 3 * H:4 * H])

        c = f_g * c + i_g * g_g                                          # (B, H) f32
        h_full = o_g * jnp.tanh(c)                                       # (B, H) f32

        # h = query + first half of the LSTM hidden state (f32 residual).
        h = q_f32 + h_full[:, :D]                                        # (B, D)

        # attn = softmax(h @ support^T); r = attn @ support (bf16 MXU, f32 acc).
        h_bf = h.astype(jnp.bfloat16)
        scores = jnp.dot(h_bf, s_t, preferred_element_type=jnp.float32)  # (B, FEW)
        scores = scores - jnp.max(scores, axis=1, keepdims=True)
        e = jnp.exp(scores)
        inv = pl.reciprocal(jnp.sum(e, axis=1, keepdims=True), approx=True)
        attn = e * inv
        r = jnp.dot(attn.astype(jnp.bfloat16), s,
                    preferred_element_type=jnp.float32)                  # (B, D)

        # Next recurrent input: concat(h, r) along lanes (2D lanes).
        hr_bf = jnp.concatenate([h_bf, r.astype(jnp.bfloat16)], axis=1)  # (B, H)

    out_ref[...] = h.astype(out_ref.dtype)


def _choose_batch_tile(B):
    """Pick (tile, padded_B). Big tiles amortize the ~0.35us/step overhead; for
    B > 8 keep >= 2 grid points so both v7x TensorCores get work."""
    Bp8 = _round_up(B, 8)
    if Bp8 <= 8:
        return Bp8, Bp8
    tb = min(512, _round_up(pl.cdiv(B, 2), 8))
    Bp = _round_up(B, tb)
    return tb, Bp


def query_encoder(query, support, w_ih, w_hh, b_ih, b_hh, process_step=4):
    """query: (B, D), support: (FEW, D); returns (B, D) like the PyTorch module."""
    assert query.shape[1] == support.shape[1]
    if process_step == 0:
        return query
    B, D = query.shape
    FEW = support.shape[0]
    H = 2 * D

    # --- parameter preprocessing (static; cache at parameter-load time in prod) ---
    # Gate-column permutation (i, f, g, o) -> (i, f, o, g).
    perm = jnp.concatenate([jnp.arange(0, 2 * H),
                            jnp.arange(3 * H, 4 * H),
                            jnp.arange(2 * H, 3 * H)])
    wih_t = jnp.asarray(w_ih, jnp.float32).T[:, perm]                 # (D, 4H)
    whh_t = jnp.asarray(w_hh, jnp.float32).T[:, perm]                 # (H, 4H)
    w_stack = jnp.concatenate([wih_t, whh_t], axis=0).astype(jnp.bfloat16)  # (3D, 4H)
    bias = (jnp.asarray(b_ih, jnp.float32)
            + jnp.asarray(b_hh, jnp.float32))[perm].reshape(1, 4 * H)  # (1, 4H) f32
    s_f32 = jnp.asarray(support, jnp.float32)
    s_bf = s_f32.astype(jnp.bfloat16)                                  # (FEW, D)
    st_bf = s_f32.T.astype(jnp.bfloat16)                               # (D, FEW)

    # --- batch tiling: rows are independent -> "parallel" grid over batch tiles ---
    tb, Bp = _choose_batch_tile(B)
    q_f32 = jnp.asarray(query, jnp.float32)
    if Bp != B:
        q_f32 = jnp.pad(q_f32, ((0, Bp - B), (0, 0)))
    grid = (Bp // tb,)

    flops = 2 * Bp * process_step * (3 * D * 4 * H + D * FEW + FEW * D)
    transcendentals = Bp * process_step * (4 * H + H + FEW)
    bytes_accessed = (q_f32.size * 4 + s_bf.size * 2 + st_bf.size * 2
                      + w_stack.size * 2 + bias.size * 4 + Bp * D * 4)

    kernel = partial(query_encoder_kernel, input_dim=D,
                     process_step=process_step)
    out = pl.pallas_call(
        kernel,
        out_shape=jax.ShapeDtypeStruct((Bp, D), jnp.float32),
        grid_spec=pltpu.PrefetchScalarGridSpec(
            num_scalar_prefetch=0,
            grid=grid,
            in_specs=[
                pl.BlockSpec((tb, D), lambda i: (i, 0)),            # query (f32)
                pl.BlockSpec((FEW, D), lambda i: (0, 0)),           # support
                pl.BlockSpec((D, FEW), lambda i: (0, 0)),           # support^T
                pl.BlockSpec((3 * D, 4 * H), lambda i: (0, 0)),     # [W_ih^T ; W_hh^T]
                pl.BlockSpec((1, 4 * H), lambda i: (0, 0)),         # bias
            ],
            out_specs=pl.BlockSpec((tb, D), lambda i: (i, 0)),
        ),
        compiler_params=pltpu.CompilerParams(
            dimension_semantics=("parallel",)),
        cost_estimate=pl.CostEstimate(
            flops=flops, transcendentals=transcendentals,
            bytes_accessed=bytes_accessed),
    )(q_f32, s_bf, st_bf, w_stack, bias)
    return out[:B]


def _reference(query, support, w_ih, w_hh, b_ih, b_hh, process_step):
    """Pure-JAX f32 reference matching the PyTorch QueryEncoder forward."""
    B, D = query.shape
    H = 2 * D
    h_r = jnp.zeros((B, H), jnp.float32)
    c = jnp.zeros((B, H), jnp.float32)
    h = query
    for _ in range(process_step):
        gates = query @ w_ih.T + h_r @ w_hh.T + b_ih + b_hh
        i = jax.nn.sigmoid(gates[:, 0 * H:1 * H])
        f = jax.nn.sigmoid(gates[:, 1 * H:2 * H])
        g = jnp.tanh(gates[:, 2 * H:3 * H])
        o = jax.nn.sigmoid(gates[:, 3 * H:4 * H])
        c = f * c + i * g
        h_full = o * jnp.tanh(c)
        h = query + h_full[:, :D]
        attn = jax.nn.softmax(h @ support.T, axis=1)
        r = attn @ support
        h_r = jnp.concatenate([h, r], axis=1)
    return h


if __name__ == "__main__":
    key = jax.random.PRNGKey(0)
    D = 32           # input_dim (support_dim == query_dim)
    H = 2 * D        # LSTMCell hidden size
    B = 8            # batch_size
    FEW = 8          # number of support rows
    PROCESS_STEP = 4

    ks = jax.random.split(key, 6)
    query = jax.random.normal(ks[0], (B, D), jnp.float32)
    support = jax.random.normal(ks[1], (FEW, D), jnp.float32)

    # Deterministic LSTMCell params (PyTorch shapes: W_* are (4H, in), b_* are (4H,))
    bound = 1.0 / (H ** 0.5)
    w_ih = jax.random.uniform(ks[2], (4 * H, D), jnp.float32, -bound, bound)
    w_hh = jax.random.uniform(ks[3], (4 * H, H), jnp.float32, -bound, bound)
    b_ih = jax.random.uniform(ks[4], (4 * H,), jnp.float32, -bound, bound)
    b_hh = jax.random.uniform(ks[5], (4 * H,), jnp.float32, -bound, bound)

    out = query_encoder(query, support, w_ih, w_hh, b_ih, b_hh,
                        process_step=PROCESS_STEP)
    out = jax.block_until_ready(out)
    assert out.shape == (B, D) and out.dtype == jnp.float32

    # Loose tolerance: bf16 MXU operands with f32 accumulation drift ~1e-2.
    ref = _reference(query, support, w_ih, w_hh, b_ih, b_hh, PROCESS_STEP)
    err = float(jnp.max(jnp.abs(out - ref)))
    assert err < 0.1, f"max abs error vs f32 reference: {err}"
    print("KERNEL_OK")
</pallas_src>

<mosaic_0001>
module attributes {stable_mosaic.version = 11 : i64} {
  func.func @query_encoder_kernel(%arg0: i32, %arg1: memref<8x32xf32, #tpu.memory_space<vmem>>, %arg2: memref<8x32xbf16, #tpu.memory_space<vmem>>, %arg3: memref<32x8xbf16, #tpu.memory_space<vmem>>, %arg4: memref<96x256xbf16, #tpu.memory_space<vmem>>, %arg5: memref<1x256xf32, #tpu.memory_space<vmem>>, %arg6: memref<8x32xf32, #tpu.memory_space<vmem>>) attributes {dimension_semantics = [#tpu.dimension_semantics<parallel>], iteration_bounds = array<i64: 1>, scalar_prefetch = 0 : i64, scratch_operands = 0 : i64, tpu.core_type = #tpu.core_type<tc>, window_params = [{transform_indices = @transform_0, window_bounds = array<i64: 8, 32>}, {pipeline_mode = #tpu.pipeline_mode<synchronous>, transform_indices = @transform_1, window_bounds = array<i64: 8, 32>}, {pipeline_mode = #tpu.pipeline_mode<synchronous>, transform_indices = @transform_2, window_bounds = array<i64: 32, 8>}, {pipeline_mode = #tpu.pipeline_mode<synchronous>, transform_indices = @transform_3, window_bounds = array<i64: 96, 256>}, {pipeline_mode = #tpu.pipeline_mode<synchronous>, transform_indices = @transform_4, window_bounds = array<i64: 1, 256>}, {transform_indices = @transform_5, window_bounds = array<i64: 8, 32>}]} {
    %c0 = arith.constant 0 : index
    %c0_0 = arith.constant 0 : index
    %0 = vector.load %arg1[%c0, %c0_0] : memref<8x32xf32, #tpu.memory_space<vmem>>, vector<8x32xf32>
    %1 = arith.truncf %0 : vector<8x32xf32> to vector<8x32xbf16>
    %c0_1 = arith.constant 0 : index
    %c0_2 = arith.constant 0 : index
    %2 = vector.load %arg2[%c0_1, %c0_2] : memref<8x32xbf16, #tpu.memory_space<vmem>>, vector<8x32xbf16>
    %c0_3 = arith.constant 0 : index
    %c0_4 = arith.constant 0 : index
    %3 = vector.load %arg3[%c0_3, %c0_4] : memref<32x8xbf16, #tpu.memory_space<vmem>>, vector<32x8xbf16>
    %c0_5 = arith.constant 0 : index
    %c0_6 = arith.constant 0 : index
    %4 = vector.load %arg4[%c0_5, %c0_6] : memref<96x256xbf16, #tpu.memory_space<vmem>>, vector<96x256xbf16>
    %c0_7 = arith.constant 0 : index
    %c0_8 = arith.constant 0 : index
    %5 = vector.load %arg5[%c0_7, %c0_8] : memref<1x256xf32, #tpu.memory_space<vmem>>, vector<1x256xf32>
    %cst = arith.constant 0.000000e+00 : f32
    %6 = vector.broadcast %cst : f32 to vector<8x64xf32>
    %cst_9 = arith.constant 0.000000e+00 : bf16
    %7 = vector.broadcast %cst_9 : bf16 to vector<8x64xbf16>
    %8 = tpu.concatenate %1, %7 in 1 : vector<8x32xbf16>, vector<8x64xbf16> -> vector<8x96xbf16>
    %cst_10 = arith.constant dense<0.000000e+00> : vector<8x256xf32>
    %9 = tpu.matmul %8, %4, %cst_10 {dimension_numbers = #tpu.dot_dimension_numbers<[1], [0], [0], [1], [0, 0, 1, 1], [], []>} : vector<8x96xbf16>, vector<96x256xbf16>, vector<8x256xf32> -> vector<8x256xf32>
    %10 = vector.broadcast %5 : vector<1x256xf32> to vector<8x256xf32>
    %11 = arith.addf %9, %10 : vector<8x256xf32>
    %12 = vector.extract_strided_slice %11 {offsets = [0, 0], sizes = [8, 192], strides = [1, 1]} : vector<8x256xf32> to vector<8x192xf32>
    %13 = arith.negf %12 : vector<8x192xf32>
    %14 = math.exp %13 : vector<8x192xf32>
    %cst_11 = arith.constant 1.000000e+00 : f32
    %15 = vector.broadcast %cst_11 : f32 to vector<8x192xf32>
    %16 = arith.addf %15, %14 : vector<8x192xf32>
    %17 = arith.divf %15, %16 : vector<8x192xf32>
    %18 = vector.extract_strided_slice %17 {offsets = [0, 0], sizes = [8, 64], strides = [1, 1]} : vector<8x192xf32> to vector<8x64xf32>
    %19 = vector.extract_strided_slice %17 {offsets = [0, 64], sizes = [8, 64], strides = [1, 1]} : vector<8x192xf32> to vector<8x64xf32>
    %20 = vector.extract_strided_slice %17 {offsets = [0, 128], sizes = [8, 64], strides = [1, 1]} : vector<8x192xf32> to vector<8x64xf32>
    %21 = vector.extract_strided_slice %11 {offsets = [0, 192], sizes = [8, 64], strides = [1, 1]} : vector<8x256xf32> to vector<8x64xf32>
    %22 = math.tanh %21 : vector<8x64xf32>
    %23 = arith.mulf %19, %6 : vector<8x64xf32>
    %24 = arith.mulf %18, %22 : vector<8x64xf32>
    %25 = arith.addf %23, %24 : vector<8x64xf32>
    %26 = math.tanh %25 : vector<8x64xf32>
    %27 = arith.mulf %20, %26 : vector<8x64xf32>
    %28 = vector.extract_strided_slice %27 {offsets = [0, 0], sizes = [8, 32], strides = [1, 1]} : vector<8x64xf32> to vector<8x32xf32>
    %29 = arith.addf %0, %28 : vector<8x32xf32>
    %30 = arith.truncf %29 : vector<8x32xf32> to vector<8x32xbf16>
    %cst_12 = arith.constant dense<0.000000e+00> : vector<8x8xf32>
    %31 = tpu.matmul %30, %3, %cst_12 {dimension_numbers = #tpu.dot_dimension_numbers<[1], [0], [0], [1], [0, 0, 1, 1], [], []>} : vector<8x32xbf16>, vector<32x8xbf16>, vector<8x8xf32> -> vector<8x8xf32>
    %cst_13 = arith.constant dense<0xFF800000> : vector<8xf32>
    %32 = vector.multi_reduction <maximumf>, %31, %cst_13 [1] : vector<8x8xf32> to vector<8xf32>
    %33 = vector.shape_cast %32 : vector<8xf32> to vector<8x1xf32>
    %34 = vector.broadcast %33 : vector<8x1xf32> to vector<8x8xf32>
    %35 = arith.subf %31, %34 : vector<8x8xf32>
    %36 = math.exp %35 : vector<8x8xf32>
    %cst_14 = arith.constant dense<0.000000e+00> : vector<8xf32>
    %37 = vector.multi_reduction <add>, %36, %cst_14 [1] : vector<8x8xf32> to vector<8xf32>
    %38 = vector.shape_cast %37 : vector<8xf32> to vector<8x1xf32>
    %39 = tpu.reciprocal %38 {approx = true} : vector<8x1xf32> -> vector<8x1xf32>
    %40 = vector.broadcast %39 : vector<8x1xf32> to vector<8x8xf32>
    %41 = arith.mulf %36, %40 : vector<8x8xf32>
    %42 = arith.truncf %41 : vector<8x8xf32> to vector<8x8xbf16>
    %cst_15 = arith.constant dense<0.000000e+00> : vector<8x32xf32>
    %43 = tpu.matmul %42, %2, %cst_15 {dimension_numbers = #tpu.dot_dimension_numbers<[1], [0], [0], [1], [0, 0, 1, 1], [], []>} : vector<8x8xbf16>, vector<8x32xbf16>, vector<8x32xf32> -> vector<8x32xf32>
    %44 = arith.truncf %43 : vector<8x32xf32> to vector<8x32xbf16>
    %45 = tpu.concatenate %30, %44 in 1 : vector<8x32xbf16>, vector<8x32xbf16> -> vector<8x64xbf16>
    %46 = tpu.concatenate %1, %45 in 1 : vector<8x32xbf16>, vector<8x64xbf16> -> vector<8x96xbf16>
    %cst_16 = arith.constant dense<0.000000e+00> : vector<8x256xf32>
    %47 = tpu.matmul %46, %4, %cst_16 {dimension_numbers = #tpu.dot_dimension_numbers<[1], [0], [0], [1], [0, 0, 1, 1], [], []>} : vector<8x96xbf16>, vector<96x256xbf16>, vector<8x256xf32> -> vector<8x256xf32>
    %48 = vector.broadcast %5 : vector<1x256xf32> to vector<8x256xf32>
    %49 = arith.addf %47, %48 : vector<8x256xf32>
    %50 = vector.extract_strided_slice %49 {offsets = [0, 0], sizes = [8, 192], strides = [1, 1]} : vector<8x256xf32> to vector<8x192xf32>
    %51 = arith.negf %50 : vector<8x192xf32>
    %52 = math.exp %51 : vector<8x192xf32>
    %cst_17 = arith.constant 1.000000e+00 : f32
    %53 = vector.broadcast %cst_17 : f32 to vector<8x192xf32>
    %54 = arith.addf %53, %52 : vector<8x192xf32>
    %55 = arith.divf %53, %54 : vector<8x192xf32>
    %56 = vector.extract_strided_slice %55 {offsets = [0, 0], sizes = [8, 64], strides = [1, 1]} : vector<8x192xf32> to vector<8x64xf32>
    %57 = vector.extract_strided_slice %55 {offsets = [0, 64], sizes = [8, 64], strides = [1, 1]} : vector<8x192xf32> to vector<8x64xf32>
    %58 = vector.extract_strided_slice %55 {offsets = [0, 128], sizes = [8, 64], strides = [1, 1]} : vector<8x192xf32> to vector<8x64xf32>
    %59 = vector.extract_strided_slice %49 {offsets = [0, 192], sizes = [8, 64], strides = [1, 1]} : vector<8x256xf32> to vector<8x64xf32>
    %60 = math.tanh %59 : vector<8x64xf32>
    %61 = arith.mulf %57, %25 : vector<8x64xf32>
    %62 = arith.mulf %56, %60 : vector<8x64xf32>
    %63 = arith.addf %61, %62 : vector<8x64xf32>
    %64 = math.tanh %63 : vector<8x64xf32>
    %65 = arith.mulf %58, %64 : vector<8x64xf32>
    %66 = vector.extract_strided_slice %65 {offsets = [0, 0], sizes = [8, 32], strides = [1, 1]} : vector<8x64xf32> to vector<8x32xf32>
    %67 = arith.addf %0, %66 : vector<8x32xf32>
    %68 = arith.truncf %67 : vector<8x32xf32> to vector<8x32xbf16>
    %cst_18 = arith.constant dense<0.000000e+00> : vector<8x8xf32>
    %69 = tpu.matmul %68, %3, %cst_18 {dimension_numbers = #tpu.dot_dimension_numbers<[1], [0], [0], [1], [0, 0, 1, 1], [], []>} : vector<8x32xbf16>, vector<32x8xbf16>, vector<8x8xf32> -> vector<8x8xf32>
    %cst_19 = arith.constant dense<0xFF800000> : vector<8xf32>
    %70 = vector.multi_reduction <maximumf>, %69, %cst_19 [1] : vector<8x8xf32> to vector<8xf32>
    %71 = vector.shape_cast %70 : vector<8xf32> to vector<8x1xf32>
    %72 = vector.broadcast %71 : vector<8x1xf32> to vector<8x8xf32>
    %73 = arith.subf %69, %72 : vector<8x8xf32>
    %74 = math.exp %73 : vector<8x8xf32>
    %cst_20 = arith.constant dense<0.000000e+00> : vector<8xf32>
    %75 = vector.multi_reduction <add>, %74, %cst_20 [1] : vector<8x8xf32> to vector<8xf32>
    %76 = vector.shape_cast %75 : vector<8xf32> to vector<8x1xf32>
    %77 = tpu.reciprocal %76 {approx = true} : vector<8x1xf32> -> vector<8x1xf32>
    %78 = vector.broadcast %77 : vector<8x1xf32> to vector<8x8xf32>
    %79 = arith.mulf %74, %78 : vector<8x8xf32>
    %80 = arith.truncf %79 : vector<8x8xf32> to vector<8x8xbf16>
    %cst_21 = arith.constant dense<0.000000e+00> : vector<8x32xf32>
    %81 = tpu.matmul %80, %2, %cst_21 {dimension_numbers = #tpu.dot_dimension_numbers<[1], [0], [0], [1], [0, 0, 1, 1], [], []>} : vector<8x8xbf16>, vector<8x32xbf16>, vector<8x32xf32> -> vector<8x32xf32>
    %82 = arith.truncf %81 : vector<8x32xf32> to vector<8x32xbf16>
    %83 = tpu.concatenate %68, %82 in 1 : vector<8x32xbf16>, vector<8x32xbf16> -> vector<8x64xbf16>
    %84 = tpu.concatenate %1, %83 in 1 : vector<8x32xbf16>, vector<8x64xbf16> -> vector<8x96xbf16>
    %cst_22 = arith.constant dense<0.000000e+00> : vector<8x256xf32>
    %85 = tpu.matmul %84, %4, %cst_22 {dimension_numbers = #tpu.dot_dimension_numbers<[1], [0], [0], [1], [0, 0, 1, 1], [], []>} : vector<8x96xbf16>, vector<96x256xbf16>, vector<8x256xf32> -> vector<8x256xf32>
    %86 = vector.broadcast %5 : vector<1x256xf32> to vector<8x256xf32>
    %87 = arith.addf %85, %86 : vector<8x256xf32>
    %88 = vector.extract_strided_slice %87 {offsets = [0, 0], sizes = [8, 192], strides = [1, 1]} : vector<8x256xf32> to vector<8x192xf32>
    %89 = arith.negf %88 : vector<8x192xf32>
    %90 = math.exp %89 : vector<8x192xf32>
    %cst_23 = arith.constant 1.000000e+00 : f32
    %91 = vector.broadcast %cst_23 : f32 to vector<8x192xf32>
    %92 = arith.addf %91, %90 : vector<8x192xf32>
    %93 = arith.divf %91, %92 : vector<8x192xf32>
    %94 = vector.extract_strided_slice %93 {offsets = [0, 0], sizes = [8, 64], strides = [1, 1]} : vector<8x192xf32> to vector<8x64xf32>
    %95 = vector.extract_strided_slice %93 {offsets = [0, 64], sizes = [8, 64], strides = [1, 1]} : vector<8x192xf32> to vector<8x64xf32>
    %96 = vector.extract_strided_slice %93 {offsets = [0, 128], sizes = [8, 64], strides = [1, 1]} : vector<8x192xf32> to vector<8x64xf32>
    %97 = vector.extract_strided_slice %87 {offsets = [0, 192], sizes = [8, 64], strides = [1, 1]} : vector<8x256xf32> to vector<8x64xf32>
    %98 = math.tanh %97 : vector<8x64xf32>
    %99 = arith.mulf %95, %63 : vector<8x64xf32>
    %100 = arith.mulf %94, %98 : vector<8x64xf32>
    %101 = arith.addf %99, %100 : vector<8x64xf32>
    %102 = math.tanh %101 : vector<8x64xf32>
    %103 = arith.mulf %96, %102 : vector<8x64xf32>
    %104 = vector.extract_strided_slice %103 {offsets = [0, 0], sizes = [8, 32], strides = [1, 1]} : vector<8x64xf32> to vector<8x32xf32>
    %105 = arith.addf %0, %104 : vector<8x32xf32>
    %106 = arith.truncf %105 : vector<8x32xf32> to vector<8x32xbf16>
    %cst_24 = arith.constant dense<0.000000e+00> : vector<8x8xf32>
    %107 = tpu.matmul %106, %3, %cst_24 {dimension_numbers = #tpu.dot_dimension_numbers<[1], [0], [0], [1], [0, 0, 1, 1], [], []>} : vector<8x32xbf16>, vector<32x8xbf16>, vector<8x8xf32> -> vector<8x8xf32>
    %cst_25 = arith.constant dense<0xFF800000> : vector<8xf32>
    %108 = vector.multi_reduction <maximumf>, %107, %cst_25 [1] : vector<8x8xf32> to vector<8xf32>
    %109 = vector.shape_cast %108 : vector<8xf32> to vector<8x1xf32>
    %110 = vector.broadcast %109 : vector<8x1xf32> to vector<8x8xf32>
    %111 = arith.subf %107, %110 : vector<8x8xf32>
    %112 = math.exp %111 : vector<8x8xf32>
    %cst_26 = arith.constant dense<0.000000e+00> : vector<8xf32>
    %113 = vector.multi_reduction <add>, %112, %cst_26 [1] : vector<8x8xf32> to vector<8xf32>
    %114 = vector.shape_cast %113 : vector<8xf32> to vector<8x1xf32>
    %115 = tpu.reciprocal %114 {approx = true} : vector<8x1xf32> -> vector<8x1xf32>
    %116 = vector.broadcast %115 : vector<8x1xf32> to vector<8x8xf32>
    %117 = arith.mulf %112, %116 : vector<8x8xf32>
    %118 = arith.truncf %117 : vector<8x8xf32> to vector<8x8xbf16>
    %cst_27 = arith.constant dense<0.000000e+00> : vector<8x32xf32>
    %119 = tpu.matmul %118, %2, %cst_27 {dimension_numbers = #tpu.dot_dimension_numbers<[1], [0], [0], [1], [0, 0, 1, 1], [], []>} : vector<8x8xbf16>, vector<8x32xbf16>, vector<8x32xf32> -> vector<8x32xf32>
    %120 = arith.truncf %119 : vector<8x32xf32> to vector<8x32xbf16>
    %121 = tpu.concatenate %106, %120 in 1 : vector<8x32xbf16>, vector<8x32xbf16> -> vector<8x64xbf16>
    %122 = tpu.concatenate %1, %121 in 1 : vector<8x32xbf16>, vector<8x64xbf16> -> vector<8x96xbf16>
    %cst_28 = arith.constant dense<0.000000e+00> : vector<8x256xf32>
    %123 = tpu.matmul %122, %4, %cst_28 {dimension_numbers = #tpu.dot_dimension_numbers<[1], [0], [0], [1], [0, 0, 1, 1], [], []>} : vector<8x96xbf16>, vector<96x256xbf16>, vector<8x256xf32> -> vector<8x256xf32>
    %124 = vector.broadcast %5 : vector<1x256xf32> to vector<8x256xf32>
    %125 = arith.addf %123, %124 : vector<8x256xf32>
    %126 = vector.extract_strided_slice %125 {offsets = [0, 0], sizes = [8, 192], strides = [1, 1]} : vector<8x256xf32> to vector<8x192xf32>
    %127 = arith.negf %126 : vector<8x192xf32>
    %128 = math.exp %127 : vector<8x192xf32>
    %cst_29 = arith.constant 1.000000e+00 : f32
    %129 = vector.broadcast %cst_29 : f32 to vector<8x192xf32>
    %130 = arith.addf %129, %128 : vector<8x192xf32>
    %131 = arith.divf %129, %130 : vector<8x192xf32>
    %132 = vector.extract_strided_slice %131 {offsets = [0, 0], sizes = [8, 64], strides = [1, 1]} : vector<8x192xf32> to vector<8x64xf32>
    %133 = vector.extract_strided_slice %131 {offsets = [0, 64], sizes = [8, 64], strides = [1, 1]} : vector<8x192xf32> to vector<8x64xf32>
    %134 = vector.extract_strided_slice %131 {offsets = [0, 128], sizes = [8, 64], strides = [1, 1]} : vector<8x192xf32> to vector<8x64xf32>
    %135 = vector.extract_strided_slice %125 {offsets = [0, 192], sizes = [8, 64], strides = [1, 1]} : vector<8x256xf32> to vector<8x64xf32>
    %136 = math.tanh %135 : vector<8x64xf32>
    %137 = arith.mulf %133, %101 : vector<8x64xf32>
    %138 = arith.mulf %132, %136 : vector<8x64xf32>
    %139 = arith.addf %137, %138 : vector<8x64xf32>
    %140 = math.tanh %139 : vector<8x64xf32>
    %141 = arith.mulf %134, %140 : vector<8x64xf32>
    %142 = vector.extract_strided_slice %141 {offsets = [0, 0], sizes = [8, 32], strides = [1, 1]} : vector<8x64xf32> to vector<8x32xf32>
    %143 = arith.addf %0, %142 : vector<8x32xf32>
    %c0_30 = arith.constant 0 : index
    %c0_31 = arith.constant 0 : index
    %144 = vector.load %arg6[%c0_30, %c0_31] : memref<8x32xf32, #tpu.memory_space<vmem>>, vector<8x32xf32>
    tpu.vector_store %arg6[%c0_30, %c0_31], %143 {strides = array<i32>} : memref<8x32xf32, #tpu.memory_space<vmem>>, vector<8x32xf32>,
    return
  }
  func.func @transform_0(%arg0: i32) -> (i32, i32) {
    %c0_i32 = arith.constant 0 : i32
    %c0_i32_0 = arith.constant 0 : i32
    return %arg0, %c0_i32 : i32, i32
  }
  func.func @transform_1(%arg0: i32) -> (i32, i32) {
    %c0_i32 = arith.constant 0 : i32
    %c0_i32_0 = arith.constant 0 : i32
    %c0_i32_1 = arith.constant 0 : i32
    return %c0_i32, %c0_i32_0 : i32, i32
  }
  func.func @transform_2(%arg0: i32) -> (i32, i32) {
    %c0_i32 = arith.constant 0 : i32
    %c0_i32_0 = arith.constant 0 : i32
    %c0_i32_1 = arith.constant 0 : i32
    return %c0_i32, %c0_i32_0 : i32, i32
  }
  func.func @transform_3(%arg0: i32) -> (i32, i32) {
    %c0_i32 = arith.constant 0 : i32
    %c0_i32_0 = arith.constant 0 : i32
    %c0_i32_1 = arith.constant 0 : i32
    return %c0_i32, %c0_i32_0 : i32, i32
  }
  func.func @transform_4(%arg0: i32) -> (i32, i32) {
    %c0_i32 = arith.constant 0 : i32
    %c0_i32_0 = arith.constant 0 : i32
    %c0_i32_1 = arith.constant 0 : i32
    return %c0_i32, %c0_i32_0 : i32, i32
  }
  func.func @transform_5(%arg0: i32) -> (i32, i32) {
    %c0_i32 = arith.constant 0 : i32
    %c0_i32_0 = arith.constant 0 : i32
    return %arg0, %c0_i32 : i32, i32
  }
}

</mosaic_0001>

<bundles_post_ra>
// kernel: tpu_custom_call.1
= control target key start
LH: loop header
LB: loop body
LE: loop exit
PB: predicated region body
PF: predicated region fallthrough
CT: control target
= control target key end

     0   :  { %10 = vsyncpa [#allocation3], 0  ;;  %s1287_s0 = inlined_call_operand.vmem [shape: f32[8,32], index: 0, kind: input, shape index: {}]   ;;  %s1288_s1 = inlined_call_operand.vmem [shape: bf16[8,32], index: 1, kind: input, shape index: {}]   ;;  %s1289_s2 = inlined_call_operand.vmem [shape: bf16[32,8], index: 2, kind: input, shape index: {}]   ;;  %s1290_s3 = inlined_call_operand.hbm [shape: bf16[96,256], index: 3, kind: input, shape index: {}]   ;;  %s1291_s4 = inlined_call_operand.vmem [shape: f32[1,256], index: 4, kind: input, shape index: {}]   ;;  %s1292_s5 = inlined_call_operand.hbm [shape: f32[8,32], index: 5, kind: output, shape index: {}]  }
   0x1   :  { %11 = vsyncpa [#allocation4], 0  ;;  %s1017_s18 = smov [#allocation2]   ;;  %s969_s22 = scalar_lea.hbm %s1290_s3, 1536 }
   0x2   :  { %s23_s19 = sshll.u32 %s1017_s18, 4  ;;  %p970_p0 = scmp.ne.s32.totalorder %s1290_s3, %s969_s22  ;;  %s24_s19 = int_to_ptr.vmem [resolvable:$true] %s23_s19 }
   0x3   :  { %p973_p1 = scmp.lt.u32.totalorder %s969_s22, %s1290_s3 }
   0x5   :  { %p975_p2 = pnand %p973_p1, %p970_p0 }
   0x7   :  { %978 = shalt.err (!%p975_p2)
}
   0x8   :  { %s979_s27 = scalar_lea.vmem %s24_s19, 1536  ;;  %p984_p4 = scmp.lt.s32.totalorder %s24_s19, %s24_s19 }
   0x9   :  { %p980_p3 = scmp.ne.s32.totalorder %s24_s19, %s979_s27  ;;  %p985_p5 = scmp.lt.s32.totalorder %s979_s27, %s979_s27 }
   0xb   :  { %p986_p6 = por %p985_p5, %p984_p4 }
   0xd   :  { %p987_p7 = pnand %p986_p6, %p980_p3 }
   0xf   :  { %990 = shalt.err (!%p987_p7)
}
  0x10   :  { %s1018_s28 = smov 128   ;;  %s1019_s29 = smov 8  }
  0x11   :  { %29 = dma.hbm_to_vmem [thread:$0]  %s1290_s3, 1536, %s24_s19, [#allocation3], %s1018_s28, %s1018_s28, %s1019_s29  }
  0x12   :  { %1013 = dma.done.wait [#allocation3], 1536  }
  0x13   :  { %1014 = vsyncadd [#allocation3], 4294965760  ;;  %v1020_v0 = vmov 0   ;;  %v1069_v1 = vld [vmem:[#allocation2 + $0x4] ss:$8 sps:$4 sm:$0xff]   ;;  %vm56_vm0 = vcmask 261120   ;;  %v61_v16 = vlaneseq }
  0x14   :  { %166 = vmatprep.mubr.bf16.mxu0 %v1020_v0  ;;  %v1071_v2 = vld [vmem:[#allocation2] ss:$8 sps:$4 sm:$0xff]   ;;  %134 = vmatprep.subr.bf16.mxu0 %v1069_v1  ;;  %v1074_v3 = vld [vmem:[#allocation2 + $0x14] ss:$8 sps:$4 sm:$0xff]   ;;  %v1077_v4 = vld [vmem:[#allocation2 + $0x10] ss:$8 sps:$4 sm:$0xff]  }
  0x15   :  { %135 = vmatpush1.bf16.msra.mxu0 %v1071_v2  ;;  %v1080_v5 = vld [vmem:[#allocation2 + $0x24] ss:$8 sps:$4 sm:$0xff]   ;;  %v1083_v6 = vld [vmem:[#allocation2 + $0x20] ss:$8 sps:$4 sm:$0xff]   ;;  %v1086_v7 = vld [vmem:[#allocation2 + $0x34] ss:$8 sps:$4 sm:$0xff]  }
  0x16   :  { %136 = vmatprep.subr.bf16.mxu0 %v1074_v3  ;;  %v1089_v8 = vld [vmem:[#allocation2 + $0x30] ss:$8 sps:$4 sm:$0xff]   ;;  %v1092_v9 = vld [vmem:[#allocation2 + $0x44] ss:$8 sps:$4 sm:$0xff]   ;;  %v1095_v10 = vld [vmem:[#allocation2 + $0x40] ss:$8 sps:$4 sm:$0xff]  }
  0x17   :  { %v1098_v11 = vld [vmem:[#allocation2 + $0x54] ss:$8 sps:$4 sm:$0xff]   ;;  %v1103_v12 = vld [vmem:[%s1287_s0] sm:$0xff]  ;;  %v1106_v13 = vld [vmem:[#allocation2 + $0x50] ss:$8 sps:$4 sm:$0xff]   ;;  %vm131_vm1 = vcmask 785408  }
  0x18   :  { %v1110_v14 = vpack.c.bf16 %v1103_v12, %v1103_v12  ;;  %v62_v17 = vshrl.u32 %v61_v16, 7  ;;  %v55_v19 = vld [vmem:[%s1291_s4] sm:$0x3]  ;;  %s1021_s9 = smov 64   ;;  %v1022_v37 = vmov 0.0   ;;  %v1142_v41 = vld [vmem:[%s1289_s2 + $0x8] sm:$0xff]  }
  0x19   :  { %137 = vmatpush1.bf16.msra.mxu0 %v1077_v4  ;;  %v1131_v36 = vld [vmem:[%s1289_s2] sm:$0xff]   ;;  %846 = vmatprep.subr.bf16.mxu1 %v1022_v37  ;;  %vm1023_vm2 = vmmov 0   ;;  %vm262_vm3 = vcmask 64512   ;;  %vm278_vm4 = vcmask 1043456   ;;  %s1025_s14 = smov [#allocation5]  }
  0x1a   :  { %138 = vmatprep.subr.bf16.mxu0 %v1080_v5  ;;  %v59_v15 = vsel %vm56_vm0, %v1110_v14, 0  ;;  %v67_v18 = vsub.s32 1, %v62_v17  ;;  %v63_v27 = vsub.s32 0, %v62_v17  ;;  %848 = vmatprep.mubr.msk.bf16.mxu1 %vm1023_vm2, %v1022_v37  ;;  %v38_v61 = vld [vmem:[%s1288_s1] sm:$0xf]  ;;  %s1024_s1 = smov 32  }
  0x1b   :  { %v1165_v62 = vsel %vm278_vm4, %v38_v61, 0  ;;  %s782_s15 = sshll.u32 %s1025_s14, 4  ;;  %s783_s15 = int_to_ptr.vmem [resolvable:$true] %s782_s15 }
  0x1c   :  { %v1120_v20 = vrot.slane %v55_v19, %v67_v18  ;;  %v1124_v28 = vrot.slane %v55_v19, %v63_v27  ;;  %847 = vmatpush3.bf16.msra.mxu1 %v1165_v62  ;;  %s991_s16 = scalar_lea.vmem %s783_s15, 128  ;;  %p996_p9 = scmp.lt.s32.totalorder %s783_s15, %s783_s15 }
  0x1d   :  { %139 = vmatpush1.bf16.msra.mxu0 %v1083_v6  ;;  %335 = vmatprep.subr.bf16.mxu1 %v1069_v1  ;;  %p992_p8 = scmp.ne.s32.totalorder %s783_s15, %s991_s16  ;;  %p997_p10 = scmp.lt.s32.totalorder %s991_s16, %s991_s16 }
  0x1e   :  { %140 = vmatprep.subr.bf16.mxu0 %v1086_v7 }
  0x1f   :  { %p998_p11 = por %p997_p10, %p996_p9 }
  0x21   :  { %141 = vmatpush1.bf16.msra.mxu0 %v1089_v8  ;;  %p999_p12 = pnand %p998_p11, %p992_p8 }
  0x22   :  { %142 = vmatprep.subr.bf16.mxu0 %v1092_v9 }
  0x25   :  { %143 = vmatpush1.bf16.msra.mxu0 %v1095_v10 }
  0x26   :  { %144 = vmatprep.subr.bf16.mxu0 %v1098_v11 }
  0x29   :  { %145 = vmatpush1.bf16.msra.mxu0 %v1106_v13 }
  0x2a   :  { %838 = vmatprep.subr.bf16.mxu0 %v1022_v37 }
  0x2c   :  { %803 = vmatmul.mubr.msk.bf16.vlgmr.msra.gmra.mrb[0].mxu0 %vm131_vm1, %v59_v15 }
  0x2d   :  { %839 = vmatpush3.bf16.msra.mxu0 %v1131_v36  ;;  %842 = vmatprep.mubr.msk.bf16.mxu0 %vm1023_vm2, %v1022_v37 }
  0x2e   :  { %840 = vmatprep.subr.bf16.mxu0 %v1022_v37 }
  0x31   :  { %841 = vmatpush3.bf16.msra.mxu0 %v1142_v41 }
  0x32   :  { %852 = vmatprep.subr.bf16.mxu0 %v1022_v37 }
  0xff   :  { %v168_v21 = vpop.f32.mrb[0].mxu0 }
 0x100   :  { %v170_v22 = vpop.f32.mrb[1].mxu0  ;;  %v169_v29 = vadd.f32 %v168_v21, %v1124_v28 }
 0x101   :  { %v171_v23 = vadd.f32 %v170_v22, %v1120_v20  ;;  %v172_v24 = vpop.f32.mrb[2].mxu0 }
 0x102   :  { %v173_v25 = vpop.f32.mrb[3].mxu0  ;;  %v804_v30 = vmul.f32 -1.442695, %v169_v29 }
 0x103   :  { %909 = vtanh.f32 %v171_v23  ;;  %v805_v43 = vmul.f32 -1.442695, %v171_v23 }
 0x104   :  { %911 = vpow2.f32 %v804_v30 }
 0x10d   :  { %v910_v26 = vpop.eup %909 }
 0x10e   :  { %190 = vrot.lane.b32.xlu0 %v910_v26, %s1021_s9  ;;  %v912_v31 = vpop.eup %911 }
 0x10f   :  { %v181_v32 = vadd.f32 1.0, %v912_v31 }
 0x111   :  { %913 = vrcp.f32 %v181_v32 }
 0x11b   :  { %v914_v33 = vpop.eup %913 }
 0x11c   :  { %v188_v38 = vmul.f32 0.0, %v914_v33 }
 0x180   :  { %v191_v34 = vpop.permute.xlu0 %190 }
 0x181   :  { %v193_v35 = vmul.f32 %v914_v33, %v191_v34 }
 0x183   :  { %195 = vrot.lane.b32.xlu0 %v193_v35, %s1021_s9 }
 0x1f5   :  { %v196_v39 = vpop.permute.xlu0 %195 }
 0x1f6   :  { %v1137_v40 = vadd.f32 %v196_v39, %v188_v38 }
 0x1f8   :  { %915 = vtanh.f32 %v1137_v40 }
 0x1f9   :  { %917 = vpow2.f32 %v805_v43 }
 0x202   :  { %v916_v42 = vpop.eup %915 }
 0x203   :  { %201 = vrot.lane.b32.xlu1 %v916_v42, %s1021_s9  ;;  %v918_v44 = vpop.eup %917 }
 0x204   :  { %v182_v45 = vadd.f32 1.0, %v918_v44 }
 0x206   :  { %919 = vrcp.f32 %v182_v45 }
 0x210   :  { %v920_v46 = vpop.eup %919 }
 0x275   :  { %v202_v47 = vpop.permute.xlu1 %201 }
 0x276   :  { %v204_v48 = vmul.f32 %v920_v46, %v202_v47 }
 0x278   :  { %v205_v49 = vadd.f32 %v204_v48, %v1103_v12 }
 0x27a   :  { %v206_v50 = vpack.c.bf16 %v205_v49, %v205_v49 }
 0x27c   :  { %843 = vmatmul.mubr.msk.bf16.vlgmr.msra.gmra.mrb[4].mxu0 %vm56_vm0, %v206_v50 }
 0x27d   :  { %853 = vmatpush3.bf16.msra.mxu0 %v1131_v36  ;;  %856 = vmatprep.mubr.msk.bf16.mxu0 %vm1023_vm2, %v1022_v37 }
 0x27e   :  { %854 = vmatprep.subr.bf16.mxu0 %v1022_v37 }
 0x281   :  { %855 = vmatpush3.bf16.msra.mxu0 %v1142_v41 }
 0x282   :  { %860 = vmatprep.subr.bf16.mxu0 %v1022_v37 }
 0x34f   :  { %v256_v51 = vpop.f32.mrb[4].mxu0 }
 0x350   :  { %v844_v52 = vpop.f32.mrb[5].mxu0  ;;  %v263_v53 = vsel %vm262_vm3, %v256_v51, -inf }
 0x351   :  { %264 = vmax.xlane.f32.xlu1 %v263_v53  ;;  %v259_v54 = vpop.f32.mrb[6].mxu0 }
 0x352   :  { %v845_v55 = vpop.f32.mrb[7].mxu0 }
 0x3de   :  { %v265_v56 = vpop.xlane.xlu1 %264 }
 0x3df   :  { %v266_v57 = vsub.f32 %v256_v51, %v265_v56 }
 0x3e1   :  { %v267_v58 = vmul.f32 1.442695, %v266_v57 }
 0x3e3   :  { %921 = vpow2.f32 %v267_v58 }
 0x3ed   :  { %v922_v59 = vpop.eup %921 }
 0x3ee   :  { %v269_v60 = vsel %vm262_vm3, %v922_v59, 0.0 }
 0x3ef   :  { %270 = vadd.xlane.f32.xlu0 %v269_v60 }
 0x47c   :  { %v271_v63 = vpop.xlane.xlu0 %270 }
 0x47d   :  { %923 = vrcp.f32 %v271_v63 }
 0x487   :  { %v924_v15 = vpop.eup %923 }
 0x488   :  { %v273_v16 = vmul.f32 %v924_v15, %v922_v59 }
 0x48a   :  { %v274_v17 = vpack.c.bf16 %v273_v16, %v273_v16 }
 0x48c   :  { %849 = vmatmul.mubr.msk.bf16.vlgmr.msra.gmra.mrb[0].mxu1 %vm262_vm3, %v274_v17 }
 0x48d   :  { %336 = vmatpush1.bf16.msra.mxu1 %v1071_v2  ;;  %367 = vmatprep.mubr.bf16.mxu1 %v1020_v0 }
 0x48e   :  { %337 = vmatprep.subr.bf16.mxu1 %v1074_v3 }
 0x491   :  { %338 = vmatpush1.bf16.msra.mxu1 %v1077_v4 }
 0x492   :  { %339 = vmatprep.subr.bf16.mxu1 %v1080_v5 }
 0x495   :  { %340 = vmatpush1.bf16.msra.mxu1 %v1083_v6 }
 0x496   :  { %341 = vmatprep.subr.bf16.mxu1 %v1086_v7 }
 0x499   :  { %342 = vmatpush1.bf16.msra.mxu1 %v1089_v8 }
 0x49a   :  { %343 = vmatprep.subr.bf16.mxu1 %v1092_v9 }
 0x49d   :  { %344 = vmatpush1.bf16.msra.mxu1 %v1095_v10 }
 0x49e   :  { %345 = vmatprep.subr.bf16.mxu1 %v1098_v11 }
 0x4a1   :  { %346 = vmatpush1.bf16.msra.mxu1 %v1106_v13 }
 0x4a2   :  { %866 = vmatprep.subr.bf16.mxu1 %v1022_v37 }
 0x55f   :  { %v316_v18 = vpop.f32.mrb[0].mxu1 }
 0x560   :  { %v322_v19 = vpack.c.bf16 %v316_v18, %v316_v18  ;;  %v850_v21 = vpop.f32.mrb[1].mxu1 }
 0x561   :  { %v319_v22 = vpop.f32.mrb[2].mxu1 }
 0x562   :  { %324 = vrot.lane.b32.xlu0 %v322_v19, %s1024_s1  ;;  %v851_v23 = vpop.f32.mrb[3].mxu1 }
 0x5d4   :  { %v325_v24 = vpop.permute.xlu0 %324 }
 0x5d5   :  { %v327_v25 = vsel %vm56_vm0, %v206_v50, %v325_v24 }
 0x5d6   :  { %329 = vrot.lane.b32.xlu1 %v327_v25, %s1024_s1 }
 0x648   :  { %v330_v26 = vpop.permute.xlu1 %329 }
 0x649   :  { %v332_v27 = vsel %vm56_vm0, %v1110_v14, %v330_v26 }
 0x64a   :  { %810 = vmatmul.mubr.msk.bf16.vlgmr.msra.gmra.mrb[4].mxu1 %vm131_vm1, %v332_v27 }
 0x64b   :  { %867 = vmatpush3.bf16.msra.mxu1 %v1131_v36  ;;  %870 = vmatprep.mubr.msk.bf16.mxu1 %vm1023_vm2, %v1022_v37 }
 0x64c   :  { %868 = vmatprep.subr.bf16.mxu1 %v1022_v37 }
 0x64f   :  { %869 = vmatpush3.bf16.msra.mxu1 %v1142_v41 }
 0x650   :  { %874 = vmatprep.subr.bf16.mxu1 %v1022_v37 }
 0x71d   :  { %v369_v29 = vpop.f32.mrb[4].mxu1 }
 0x71e   :  { %v371_v30 = vpop.f32.mrb[5].mxu1  ;;  %v370_v35 = vadd.f32 %v369_v29, %v1124_v28 }
 0x71f   :  { %v372_v31 = vadd.f32 %v371_v30, %v1120_v20  ;;  %v373_v32 = vpop.f32.mrb[6].mxu1 }
 0x720   :  { %v374_v33 = vpop.f32.mrb[7].mxu1  ;;  %v811_v36 = vmul.f32 -1.442695, %v370_v35 }
 0x721   :  { %925 = vtanh.f32 %v372_v31  ;;  %v812_v48 = vmul.f32 -1.442695, %v372_v31 }
 0x722   :  { %927 = vpow2.f32 %v811_v36 }
 0x72b   :  { %v926_v34 = vpop.eup %925 }
 0x72c   :  { %391 = vrot.lane.b32.xlu1 %v926_v34, %s1021_s9  ;;  %v928_v38 = vpop.eup %927 }
 0x72d   :  { %v382_v39 = vadd.f32 1.0, %v928_v38 }
 0x72f   :  { %929 = vrcp.f32 %v382_v39 }
 0x739   :  { %v930_v41 = vpop.eup %929 }
 0x73a   :  { %v389_v44 = vmul.f32 %v930_v41, %v1137_v40 }
 0x79e   :  { %v392_v42 = vpop.permute.xlu1 %391 }
 0x79f   :  { %v394_v43 = vmul.f32 %v930_v41, %v392_v42 }
 0x7a1   :  { %396 = vrot.lane.b32.xlu0 %v394_v43, %s1021_s9 }
 0x813   :  { %v397_v45 = vpop.permute.xlu0 %396 }
 0x814   :  { %v1200_v46 = vadd.f32 %v397_v45, %v389_v44 }
 0x816   :  { %931 = vtanh.f32 %v1200_v46 }
 0x817   :  { %933 = vpow2.f32 %v812_v48 }
 0x820   :  { %v932_v47 = vpop.eup %931 }
 0x821   :  { %402 = vrot.lane.b32.xlu1 %v932_v47, %s1021_s9  ;;  %v934_v49 = vpop.eup %933 }
 0x822   :  { %v383_v50 = vadd.f32 1.0, %v934_v49 }
 0x824   :  { %935 = vrcp.f32 %v383_v50 }
 0x82e   :  { %v936_v51 = vpop.eup %935 }
 0x893   :  { %v403_v52 = vpop.permute.xlu1 %402 }
 0x894   :  { %v405_v53 = vmul.f32 %v936_v51, %v403_v52 }
 0x896   :  { %v406_v54 = vadd.f32 %v405_v53, %v1103_v12 }
 0x898   :  { %v407_v55 = vpack.c.bf16 %v406_v54, %v406_v54 }
 0x89a   :  { %857 = vmatmul.mubr.msk.bf16.vlgmr.msra.gmra.mrb[8].mxu0 %vm56_vm0, %v407_v55 }
 0x89b   :  { %861 = vmatpush3.bf16.msra.mxu0 %v1165_v62  ;;  %862 = vmatprep.mubr.msk.bf16.mxu0 %vm1023_vm2, %v1022_v37 }
 0x89c   :  { %519 = vmatprep.subr.bf16.mxu0 %v1069_v1 }
 0x96d   :  { %v445_v40 = vpop.f32.mrb[8].mxu0 }
 0x96e   :  { %v858_v56 = vpop.f32.mrb[9].mxu0  ;;  %v451_v57 = vsel %vm262_vm3, %v445_v40, -inf }
 0x96f   :  { %452 = vmax.xlane.f32.xlu0 %v451_v57  ;;  %v448_v58 = vpop.f32.mrb[10].mxu0 }
 0x970   :  { %v859_v59 = vpop.f32.mrb[11].mxu0 }
 0x9fc   :  { %v453_v60 = vpop.xlane.xlu0 %452 }
 0x9fd   :  { %v454_v61 = vsub.f32 %v445_v40, %v453_v60 }
 0x9ff   :  { %v455_v63 = vmul.f32 1.442695, %v454_v61 }
 0xa01   :  { %937 = vpow2.f32 %v455_v63 }
 0xa0b   :  { %v938_v15 = vpop.eup %937 }
 0xa0c   :  { %v457_v16 = vsel %vm262_vm3, %v938_v15, 0.0 }
 0xa0d   :  { %458 = vadd.xlane.f32.xlu1 %v457_v16 }
 0xa9a   :  { %v459_v17 = vpop.xlane.xlu1 %458 }
 0xa9b   :  { %939 = vrcp.f32 %v459_v17 }
 0xaa5   :  { %v940_v18 = vpop.eup %939 }
 0xaa6   :  { %v461_v19 = vmul.f32 %v940_v18, %v938_v15 }
 0xaa8   :  { %v462_v21 = vpack.c.bf16 %v461_v19, %v461_v19 }
 0xaaa   :  { %863 = vmatmul.mubr.msk.bf16.vlgmr.msra.gmra.mrb[12].mxu0 %vm262_vm3, %v462_v21 }
 0xaab   :  { %520 = vmatpush1.bf16.msra.mxu0 %v1071_v2  ;;  %551 = vmatprep.mubr.bf16.mxu0 %v1020_v0 }
 0xaac   :  { %521 = vmatprep.subr.bf16.mxu0 %v1074_v3 }
 0xaaf   :  { %522 = vmatpush1.bf16.msra.mxu0 %v1077_v4 }
 0xab0   :  { %523 = vmatprep.subr.bf16.mxu0 %v1080_v5 }
 0xab3   :  { %524 = vmatpush1.bf16.msra.mxu0 %v1083_v6 }
 0xab4   :  { %525 = vmatprep.subr.bf16.mxu0 %v1086_v7 }
 0xab7   :  { %526 = vmatpush1.bf16.msra.mxu0 %v1089_v8 }
 0xab8   :  { %527 = vmatprep.subr.bf16.mxu0 %v1092_v9 }
 0xabb   :  { %528 = vmatpush1.bf16.msra.mxu0 %v1095_v10 }
 0xabc   :  { %529 = vmatprep.subr.bf16.mxu0 %v1098_v11 }
 0xabf   :  { %530 = vmatpush1.bf16.msra.mxu0 %v1106_v13 }
 0xb7d   :  { %v500_v22 = vpop.f32.mrb[12].mxu0 }
 0xb7e   :  { %v506_v23 = vpack.c.bf16 %v500_v22, %v500_v22  ;;  %v864_v24 = vpop.f32.mrb[13].mxu0 }
 0xb7f   :  { %v503_v25 = vpop.f32.mrb[14].mxu0 }
 0xb80   :  { %508 = vrot.lane.b32.xlu0 %v506_v23, %s1024_s1  ;;  %v865_v26 = vpop.f32.mrb[15].mxu0 }
 0xbf2   :  { %v509_v27 = vpop.permute.xlu0 %508 }
 0xbf3   :  { %v511_v29 = vsel %vm56_vm0, %v407_v55, %v509_v27 }
 0xbf4   :  { %513 = vrot.lane.b32.xlu1 %v511_v29, %s1024_s1 }
 0xc66   :  { %v514_v30 = vpop.permute.xlu1 %513 }
 0xc67   :  { %v516_v31 = vsel %vm56_vm0, %v1110_v14, %v514_v30 }
 0xc68   :  { %815 = vmatmul.mubr.msk.bf16.vlgmr.msra.gmra.mrb[16].mxu0 %vm131_vm1, %v516_v31 }
 0xd3b   :  { %v553_v32 = vpop.f32.mrb[16].mxu0 }
 0xd3c   :  { %v555_v33 = vpop.f32.mrb[17].mxu0  ;;  %v554_v39 = vadd.f32 %v553_v32, %v1124_v28 }
 0xd3d   :  { %v556_v34 = vadd.f32 %v555_v33, %v1120_v20  ;;  %v557_v35 = vpop.f32.mrb[18].mxu0 }
 0xd3e   :  { %v558_v36 = vpop.f32.mrb[19].mxu0  ;;  %v816_v41 = vmul.f32 -1.442695, %v554_v39 }
 0xd3f   :  { %941 = vtanh.f32 %v556_v34  ;;  %v817_v52 = vmul.f32 -1.442695, %v556_v34 }
 0xd40   :  { %943 = vpow2.f32 %v816_v41 }
 0xd49   :  { %v942_v38 = vpop.eup %941 }
 0xd4a   :  { %575 = vrot.lane.b32.xlu0 %v942_v38, %s1021_s9  ;;  %v944_v42 = vpop.eup %943 }
 0xd4b   :  { %v566_v43 = vadd.f32 1.0, %v944_v42 }
 0xd4d   :  { %945 = vrcp.f32 %v566_v43 }
 0xd57   :  { %v946_v44 = vpop.eup %945 }
 0xd58   :  { %v573_v48 = vmul.f32 %v946_v44, %v1200_v46 }
 0xdbc   :  { %v576_v45 = vpop.permute.xlu0 %575 }
 0xdbd   :  { %v578_v47 = vmul.f32 %v946_v44, %v576_v45 }
 0xdbf   :  { %580 = vrot.lane.b32.xlu1 %v578_v47, %s1021_s9 }
 0xe31   :  { %v581_v49 = vpop.permute.xlu1 %580 }
 0xe32   :  { %v1236_v50 = vadd.f32 %v581_v49, %v573_v48 }
 0xe34   :  { %947 = vtanh.f32 %v1236_v50 }
 0xe35   :  { %949 = vpow2.f32 %v817_v52 }
 0xe3e   :  { %v948_v51 = vpop.eup %947 }
 0xe3f   :  { %586 = vrot.lane.b32.xlu0 %v948_v51, %s1021_s9  ;;  %v950_v53 = vpop.eup %949 }
 0xe40   :  { %v567_v54 = vadd.f32 1.0, %v950_v53 }
 0xe42   :  { %951 = vrcp.f32 %v567_v54 }
 0xe4c   :  { %v952_v55 = vpop.eup %951 }
 0xeb1   :  { %v587_v40 = vpop.permute.xlu0 %586 }
 0xeb2   :  { %v589_v56 = vmul.f32 %v952_v55, %v587_v40 }
 0xeb4   :  { %v590_v57 = vadd.f32 %v589_v56, %v1103_v12 }
 0xeb6   :  { %v591_v58 = vpack.c.bf16 %v590_v57, %v590_v57 }
 0xeb8   :  { %871 = vmatmul.mubr.msk.bf16.vlgmr.msra.gmra.mrb[8].mxu1 %vm56_vm0, %v591_v58 }
 0xeb9   :  { %875 = vmatpush3.bf16.msra.mxu1 %v1165_v62  ;;  %876 = vmatprep.mubr.msk.bf16.mxu1 %vm1023_vm2, %v1022_v37 }
 0xeba   :  { %703 = vmatprep.subr.bf16.mxu1 %v1069_v1 }
 0xf8b   :  { %v629_v46 = vpop.f32.mrb[8].mxu1 }
 0xf8c   :  { %v872_v59 = vpop.f32.mrb[9].mxu1  ;;  %v635_v60 = vsel %vm262_vm3, %v629_v46, -inf }
 0xf8d   :  { %636 = vmax.xlane.f32.xlu1 %v635_v60  ;;  %v632_v61 = vpop.f32.mrb[10].mxu1 }
 0xf8e   :  { %v873_v63 = vpop.f32.mrb[11].mxu1 }
0x101a   :  { %v637_v15 = vpop.xlane.xlu1 %636 }
0x101b   :  { %v638_v16 = vsub.f32 %v629_v46, %v637_v15 }
0x101d   :  { %v639_v17 = vmul.f32 1.442695, %v638_v16 }
0x101f   :  { %953 = vpow2.f32 %v639_v17 }
0x1029   :  { %v954_v18 = vpop.eup %953 }
0x102a   :  { %v641_v19 = vsel %vm262_vm3, %v954_v18, 0.0 }
0x102b   :  { %642 = vadd.xlane.f32.xlu0 %v641_v19 }
0x10b8   :  { %v643_v62 = vpop.xlane.xlu0 %642 }
0x10b9   :  { %955 = vrcp.f32 %v643_v62 }
0x10c3   :  { %v956_v37 = vpop.eup %955 }
0x10c4   :  { %v645_v21 = vmul.f32 %v956_v37, %v954_v18 }
0x10c6   :  { %v646_v1 = vpack.c.bf16 %v645_v21, %v645_v21 }
0x10c8   :  { %877 = vmatmul.mubr.msk.bf16.vlgmr.msra.gmra.mrb[12].mxu1 %vm262_vm3, %v646_v1 }
0x10c9   :  { %704 = vmatpush1.bf16.msra.mxu1 %v1071_v2  ;;  %735 = vmatprep.mubr.bf16.mxu1 %v1020_v0 }
0x10ca   :  { %705 = vmatprep.subr.bf16.mxu1 %v1074_v3 }
0x10cd   :  { %706 = vmatpush1.bf16.msra.mxu1 %v1077_v4 }
0x10ce   :  { %707 = vmatprep.subr.bf16.mxu1 %v1080_v5 }
0x10d1   :  { %708 = vmatpush1.bf16.msra.mxu1 %v1083_v6 }
0x10d2   :  { %709 = vmatprep.subr.bf16.mxu1 %v1086_v7 }
0x10d5   :  { %710 = vmatpush1.bf16.msra.mxu1 %v1089_v8 }
0x10d6   :  { %711 = vmatprep.subr.bf16.mxu1 %v1092_v9 }
0x10d9   :  { %712 = vmatpush1.bf16.msra.mxu1 %v1095_v10 }
0x10da   :  { %713 = vmatprep.subr.bf16.mxu1 %v1098_v11 }
0x10dd   :  { %714 = vmatpush1.bf16.msra.mxu1 %v1106_v13 }
0x119b   :  { %v684_v0 = vpop.f32.mrb[12].mxu1 }
0x119c   :  { %v690_v2 = vpack.c.bf16 %v684_v0, %v684_v0  ;;  %v878_v3 = vpop.f32.mrb[13].mxu1 }
0x119d   :  { %v687_v4 = vpop.f32.mrb[14].mxu1 }
0x119e   :  { %692 = vrot.lane.b32.xlu0 %v690_v2, %s1024_s1  ;;  %v879_v5 = vpop.f32.mrb[15].mxu1 }
0x1210   :  { %v693_v6 = vpop.permute.xlu0 %692 }
0x1211   :  { %v695_v7 = vsel %vm56_vm0, %v591_v58, %v693_v6 }
0x1212   :  { %697 = vrot.lane.b32.xlu1 %v695_v7, %s1024_s1 }
0x1284   :  { %v698_v8 = vpop.permute.xlu1 %697 }
0x1285   :  { %v700_v9 = vsel %vm56_vm0, %v1110_v14, %v698_v8 }
0x1286   :  { %820 = vmatmul.mubr.msk.bf16.vlgmr.msra.gmra.mrb[16].mxu1 %vm131_vm1, %v700_v9 }
0x1359   :  { %v737_v10 = vpop.f32.mrb[16].mxu1 }
0x135a   :  { %v739_v11 = vpop.f32.mrb[17].mxu1  ;;  %v738_v25 = vadd.f32 %v737_v10, %v1124_v28 }
0x135b   :  { %v740_v13 = vadd.f32 %v739_v11, %v1120_v20  ;;  %v741_v22 = vpop.f32.mrb[18].mxu1 }
0x135c   :  { %v742_v23 = vpop.f32.mrb[19].mxu1  ;;  %v821_v26 = vmul.f32 -1.442695, %v738_v25 }
0x135d   :  { %957 = vtanh.f32 %v740_v13  ;;  %v822_v35 = vmul.f32 -1.442695, %v740_v13 }
0x135e   :  { %959 = vpow2.f32 %v821_v26 }
0x1367   :  { %v958_v24 = vpop.eup %957 }
0x1368   :  { %759 = vrot.lane.b32.xlu1 %v958_v24, %s1021_s9  ;;  %v960_v27 = vpop.eup %959 }
0x1369   :  { %v750_v29 = vadd.f32 1.0, %v960_v27 }
0x136b   :  { %961 = vrcp.f32 %v750_v29 }
0x1375   :  { %v962_v14 = vpop.eup %961 }
0x1376   :  { %v757_v20 = vmul.f32 %v962_v14, %v1236_v50 }
0x13da   :  { %v760_v30 = vpop.permute.xlu1 %759 }
0x13db   :  { %v762_v31 = vmul.f32 %v962_v14, %v760_v30 }
0x13dd   :  { %764 = vrot.lane.b32.xlu0 %v762_v31, %s1021_s9 }
0x144f   :  { %v765_v32 = vpop.permute.xlu0 %764 }
0x1450   :  { %v767_v33 = vadd.f32 %v765_v32, %v757_v20 }
0x1452   :  { %963 = vtanh.f32 %v767_v33 }
0x1453   :  { %965 = vpow2.f32 %v822_v35 }
0x145c   :  { %v964_v34 = vpop.eup %963 }
0x145d   :  { %770 = vrot.lane.b32.xlu1 %v964_v34, %s1021_s9  ;;  %v966_v28 = vpop.eup %965 }
0x145e   :  { %v751_v36 = vadd.f32 1.0, %v966_v28 }
0x1460   :  { %967 = vrcp.f32 %v751_v36 }
0x146a   :  { %v968_v38 = vpop.eup %967 }
0x14cf   :  { %v771_v39 = vpop.permute.xlu1 %770 }
0x14d0   :  { %v773_v41 = vmul.f32 %v968_v38, %v771_v39 }
0x14d2   :  { %v774_v42 = vadd.f32 %v773_v41, %v1103_v12 }
0x14d4   :  { %775 = vst.msk [vmem:[#allocation5] sm:$0xff] %vm56_vm0, %v774_v42 }
0x14d5   :  { %1002 = shalt.err (!%p999_p12)
}
0x14d6   :  { %s1003_s19 = scalar_lea.hbm %s1292_s5, 128 }
0x14d7   :  { %p1004_p13 = scmp.ne.s32.totalorder %s1292_s5, %s1003_s19  ;;  %p1007_p0 = scmp.lt.u32.totalorder %s1003_s19, %s1292_s5 }
0x14d9   :  { %p1009_p1 = pnand %p1007_p0, %p1004_p13 }
0x14db   :  { %1012 = shalt.err (!%p1009_p1)
}
0x14dc   :  { %785 = dma.vmem_to_hbm [thread:$0]  %s783_s15, 128, %s1292_s5, [#allocation4]  }
0x14dd   :  { %1015 = dma.done.wait [#allocation4], 128  }
0x14de   :  { %1016 = vsyncadd [#allocation4], 4294967168 }
0x14df   :  { %789 = vsyncpa [#allocation3], 1 }
0x14e0   :  { %790 = vsyncpa [#allocation4], 1 }

</bundles_post_ra>
